<compile_context>
chip_gen: v6e
topology: v6e:2x2x1
jax: 0.10.0
libtpu: 0.0.40
codegen_flags: <defaults>
</compile_context>

<pallas_src>
import functools

import jax
import jax.numpy as jnp
from jax.experimental import pallas as pl
from jax.experimental.pallas import tpu as pltpu

CIN = 4
COUT = 7
KH, KW = 5, 5
PAD = 2
COUT_PAD = 8  # pad Cout 7 -> 8 (sublane multiple); sliced off in the wrapper
NEGATIVE_SLOPE = 0.10669922  # kept for the reference check; folds away after ReLU
K = CIN * KH * KW  # 100


def conv_gemm_kernel(p_ref, w_ref, b_ref, o_ref):
    # p_ref: (K, N*HW)        im2col patches, lane dim = N*HW (multiple of 128)
    # w_ref: (COUT_PAD, K)    flattened conv weight, channel-padded to 8 rows
    # b_ref: (COUT_PAD, 1)    bias column
    # o_ref: (COUT_PAD, N*HW) lane-dense output
    acc = jnp.dot(w_ref[...], p_ref[...], preferred_element_type=jnp.float32)
    # v2 = relu(v1); where(v2>0, v2, v2*slope) == v2 since v2 >= 0.
    o_ref[...] = jnp.maximum(acc + b_ref[...], 0.0).astype(o_ref.dtype)


def prepare_params(weight, bias):
    """One-time preprocessing of conv params into the MXU layout."""
    w_mat = weight.reshape(COUT, K)                        # K ordered (cin, kh, kw)
    w_mat = jnp.pad(w_mat, ((0, COUT_PAD - COUT), (0, 0)))  # (8, 100)
    b_col = jnp.pad(bias, (0, COUT_PAD - COUT)).reshape(COUT_PAD, 1)
    return w_mat, b_col


@jax.jit
def model_forward(x_nchw, w_mat, b_col):
    """x_nchw: (N, Cin, H, W); w_mat: (8, 100); b_col: (8, 1)."""
    N, Cin, H, W = x_nchw.shape
    HW = H * W

    # Pad spatially (padding=2, stride=1).
    x_pad = jnp.pad(x_nchw, ((0, 0), (0, 0), (PAD, PAD), (PAD, PAD)))

    # im2col, built so the final layout is (K, N*HW):
    #   patches[cin*25 + kh*5 + kw, n*HW + h*W + w] = x_pad[n, cin, h+kh, w+kw]
    # Matches weight.reshape(Cout, K) ordering (cin, kh, kw). Fused by XLA.
    cols = []
    for kh in range(KH):
        for kw in range(KW):
            cols.append(x_pad[:, :, kh:kh + H, kw:kw + W])  # (N, Cin, H, W)
    patches = jnp.stack(cols, axis=2)                       # (N, Cin, KH*KW, H, W)
    patches = patches.transpose(1, 2, 0, 3, 4).reshape(K, N * HW)

    flops = 2 * COUT_PAD * K * N * HW
    bytes_accessed = 4 * (K * N * HW + COUT_PAD * K + COUT_PAD + COUT_PAD * N * HW)

    out = pl.pallas_call(
        conv_gemm_kernel,
        out_shape=jax.ShapeDtypeStruct((COUT_PAD, N * HW), x_nchw.dtype),
        in_specs=[
            pl.BlockSpec(memory_space=pltpu.MemorySpace.VMEM),  # patches
            pl.BlockSpec(memory_space=pltpu.MemorySpace.VMEM),  # weight
            pl.BlockSpec(memory_space=pltpu.MemorySpace.VMEM),  # bias
        ],
        out_specs=pl.BlockSpec(memory_space=pltpu.MemorySpace.VMEM),
        cost_estimate=pl.CostEstimate(
            flops=flops, transcendentals=0, bytes_accessed=bytes_accessed),
    )(patches, w_mat, b_col)

    # Drop padded channel row, reshape back to NCHW (fused / effectively free).
    return out[:COUT].reshape(COUT, N, H, W).transpose(1, 0, 2, 3)


if __name__ == "__main__":
    key = jax.random.PRNGKey(0)
    k_x, k_w, k_b = jax.random.split(key, 3)

    N, Cin, H, W = 2, 4, 16, 16
    Cout = 7

    x = jax.random.normal(k_x, (N, Cin, H, W), dtype=jnp.float32)
    # Deterministic parameter init (Conv2d(4, 7, 5) shapes).
    fan_in = Cin * KH * KW
    bound = 1.0 / (fan_in ** 0.5)
    weight = jax.random.uniform(
        k_w, (Cout, Cin, KH, KW), minval=-bound, maxval=bound, dtype=jnp.float32
    )
    bias = jax.random.uniform(
        k_b, (Cout,), minval=-bound, maxval=bound, dtype=jnp.float32
    )

    # Hoisted once-per-model parameter prep.
    w_mat, b_col = prepare_params(weight, bias)

    out = model_forward(x, w_mat, b_col)
    jax.block_until_ready(out)
    assert out.shape == (N, Cout, H, W)

    # Regression check: keeps the im2col K ordering and weight flattening honest.
    ref = jax.lax.conv_general_dilated(
        x, weight, window_strides=(1, 1), padding=((PAD, PAD), (PAD, PAD)),
        dimension_numbers=("NCHW", "OIHW", "NCHW"),
        precision=jax.lax.Precision.HIGHEST)
    ref = jnp.maximum(ref + bias.reshape(1, Cout, 1, 1), 0.0)
    ref = jnp.where(ref > 0, ref, ref * NEGATIVE_SLOPE)
    assert jnp.allclose(out, ref, atol=1e-2, rtol=1e-2), "mismatch vs XLA conv reference"

    print("KERNEL_OK")
</pallas_src>

<mosaic_0001>
module attributes {stable_mosaic.version = 11 : i64} {
  func.func @conv_gemm_kernel(%arg0: memref<100x512xf32, #tpu.memory_space<vmem>>, %arg1: memref<8x100xf32, #tpu.memory_space<vmem>>, %arg2: memref<8x1xf32, #tpu.memory_space<vmem>>, %arg3: memref<8x512xf32, #tpu.memory_space<vmem>>) attributes {dimension_semantics = [], scalar_prefetch = 0 : i64, scratch_operands = 0 : i64, tpu.core_type = #tpu.core_type<tc>} {
    %c0 = arith.constant 0 : index
    %c0_0 = arith.constant 0 : index
    %0 = vector.load %arg1[%c0, %c0_0] : memref<8x100xf32, #tpu.memory_space<vmem>>, vector<8x100xf32>
    %c0_1 = arith.constant 0 : index
    %c0_2 = arith.constant 0 : index
    %1 = vector.load %arg0[%c0_1, %c0_2] : memref<100x512xf32, #tpu.memory_space<vmem>>, vector<100x512xf32>
    %cst = arith.constant dense<0.000000e+00> : vector<8x512xf32>
    %2 = tpu.matmul %0, %1, %cst {dimension_numbers = #tpu.dot_dimension_numbers<[1], [0], [0], [1], [0, 0, 1, 1], [], []>} : vector<8x100xf32>, vector<100x512xf32>, vector<8x512xf32> -> vector<8x512xf32>
    %c0_3 = arith.constant 0 : index
    %c0_4 = arith.constant 0 : index
    %3 = vector.load %arg2[%c0_3, %c0_4] : memref<8x1xf32, #tpu.memory_space<vmem>>, vector<8x1xf32>
    %4 = vector.broadcast %3 : vector<8x1xf32> to vector<8x512xf32>
    %5 = arith.addf %2, %4 : vector<8x512xf32>
    %cst_5 = arith.constant 0.000000e+00 : f32
    %6 = vector.broadcast %cst_5 : f32 to vector<8x512xf32>
    %7 = arith.maximumf %5, %6 : vector<8x512xf32>
    %c0_6 = arith.constant 0 : index
    %c0_7 = arith.constant 0 : index
    %8 = vector.load %arg3[%c0_6, %c0_7] : memref<8x512xf32, #tpu.memory_space<vmem>>, vector<8x512xf32>
    tpu.vector_store %arg3[%c0_6, %c0_7], %7 {strides = array<i32>} : memref<8x512xf32, #tpu.memory_space<vmem>>, vector<8x512xf32>,
    return
  }
}

</mosaic_0001>

<bundles_post_ra>
// kernel: model_forward.1
= control target key start
LH: loop header
LB: loop body
LE: loop exit
PB: predicated region body
PF: predicated region fallthrough
CT: control target
= control target key end

     0   :  { %vm77_vm0 = vcmask 1043456   ;;  %v253_v3 = vmov 0.0   ;;  %vm73_vm1 = vcmask 818176   ;;  %v254_v55 = vmov 0   ;;  %s449_s0 = inlined_call_operand.vmem [shape: f32[100,512], index: 0, kind: input, shape index: {}]   ;;  %s450_s1 = inlined_call_operand.vmem [shape: f32[8,100], index: 1, kind: input, shape index: {}]   ;;  %s451_s2 = inlined_call_operand.vmem [shape: f32[8,1], index: 2, kind: input, shape index: {}]   ;;  %s452_s3 = inlined_call_operand.vmem [shape: f32[8,512], index: 3, kind: output, shape index: {}]  }
   0x1   :  { %v64_v0 = vld [vmem:[%s449_s0 + $0x188] sm:$0xf]  ;;  %v66_v1 = vld [vmem:[%s449_s0 + $0x198] sm:$0xf]  ;;  %v63_v2 = vld [vmem:[%s449_s0 + $0x180] sm:$0xf]  ;;  %154 = vmatprep.mubr.f32.mxu0 %v253_v3  ;;  %225 = vmatprep.mubr.f32.mxu1 %v253_v3 }
   0x2   :  { %244 = vmatprep.subr.msk.mxu0 %vm77_vm0, %v64_v0  ;;  %247 = vmatprep.subr.msk.mxu1 %vm77_vm0, %v66_v1  ;;  %v65_v4 = vld [vmem:[%s449_s0 + $0x190] sm:$0xf]  ;;  %v60_v5 = vld [vmem:[%s449_s0 + $0x168] sm:$0xff]  ;;  %v62_v6 = vld [vmem:[%s449_s0 + $0x178] sm:$0xff] }
   0x3   :  { %245 = vmatpush1.msk.msra.mxu0 %vm77_vm0, %v63_v2  ;;  %248 = vmatpush1.msk.msra.mxu1 %vm77_vm0, %v65_v4  ;;  %v59_v7 = vld [vmem:[%s449_s0 + $0x160] sm:$0xff]  ;;  %v61_v8 = vld [vmem:[%s449_s0 + $0x170] sm:$0xff]  ;;  %v56_v9 = vld [vmem:[%s449_s0 + $0x148] sm:$0xff] }
   0x4   :  { %98 = vmatprep.subr.mxu0 %v60_v5  ;;  %169 = vmatprep.subr.mxu1 %v62_v6  ;;  %v58_v10 = vld [vmem:[%s449_s0 + $0x158] sm:$0xff]  ;;  %v55_v11 = vld [vmem:[%s449_s0 + $0x140] sm:$0xff]  ;;  %v57_v12 = vld [vmem:[%s449_s0 + $0x150] sm:$0xff] }
   0x5   :  { %99 = vmatpush1.msra.mxu0 %v59_v7  ;;  %170 = vmatpush1.msra.mxu1 %v61_v8  ;;  %v52_v13 = vld [vmem:[%s449_s0 + $0x128] sm:$0xff]  ;;  %v54_v14 = vld [vmem:[%s449_s0 + $0x138] sm:$0xff]  ;;  %v51_v15 = vld [vmem:[%s449_s0 + $0x120] sm:$0xff] }
   0x6   :  { %100 = vmatprep.subr.mxu0 %v56_v9  ;;  %171 = vmatprep.subr.mxu1 %v58_v10  ;;  %v53_v16 = vld [vmem:[%s449_s0 + $0x130] sm:$0xff]  ;;  %v48_v17 = vld [vmem:[%s449_s0 + $0x108] sm:$0xff]  ;;  %v50_v18 = vld [vmem:[%s449_s0 + $0x118] sm:$0xff] }
   0x7   :  { %101 = vmatpush1.msra.mxu0 %v55_v11  ;;  %172 = vmatpush1.msra.mxu1 %v57_v12  ;;  %v47_v19 = vld [vmem:[%s449_s0 + $0x100] sm:$0xff]  ;;  %v49_v20 = vld [vmem:[%s449_s0 + $0x110] sm:$0xff]  ;;  %v44_v21 = vld [vmem:[%s449_s0 + $0xe8] sm:$0xff] }
   0x8   :  { %102 = vmatprep.subr.mxu0 %v52_v13  ;;  %173 = vmatprep.subr.mxu1 %v54_v14  ;;  %v46_v22 = vld [vmem:[%s449_s0 + $0xf8] sm:$0xff]  ;;  %v43_v23 = vld [vmem:[%s449_s0 + $0xe0] sm:$0xff]  ;;  %v45_v24 = vld [vmem:[%s449_s0 + $0xf0] sm:$0xff] }
   0x9   :  { %103 = vmatpush1.msra.mxu0 %v51_v15  ;;  %174 = vmatpush1.msra.mxu1 %v53_v16  ;;  %v40_v25 = vld [vmem:[%s449_s0 + $0xc8] sm:$0xff]  ;;  %v42_v26 = vld [vmem:[%s449_s0 + $0xd8] sm:$0xff]  ;;  %v39_v27 = vld [vmem:[%s449_s0 + $0xc0] sm:$0xff] }
   0xa   :  { %104 = vmatprep.subr.mxu0 %v48_v17  ;;  %175 = vmatprep.subr.mxu1 %v50_v18  ;;  %v41_v28 = vld [vmem:[%s449_s0 + $0xd0] sm:$0xff]  ;;  %v36_v29 = vld [vmem:[%s449_s0 + $0xa8] sm:$0xff]  ;;  %v38_v30 = vld [vmem:[%s449_s0 + $0xb8] sm:$0xff] }
   0xb   :  { %105 = vmatpush1.msra.mxu0 %v47_v19  ;;  %176 = vmatpush1.msra.mxu1 %v49_v20  ;;  %v35_v31 = vld [vmem:[%s449_s0 + $0xa0] sm:$0xff]  ;;  %v37_v32 = vld [vmem:[%s449_s0 + $0xb0] sm:$0xff]  ;;  %v32_v33 = vld [vmem:[%s449_s0 + $0x88] sm:$0xff] }
   0xc   :  { %106 = vmatprep.subr.mxu0 %v44_v21  ;;  %177 = vmatprep.subr.mxu1 %v46_v22  ;;  %v34_v34 = vld [vmem:[%s449_s0 + $0x98] sm:$0xff]  ;;  %v31_v35 = vld [vmem:[%s449_s0 + $0x80] sm:$0xff]  ;;  %v33_v36 = vld [vmem:[%s449_s0 + $0x90] sm:$0xff] }
   0xd   :  { %107 = vmatpush1.msra.mxu0 %v43_v23  ;;  %178 = vmatpush1.msra.mxu1 %v45_v24  ;;  %v28_v37 = vld [vmem:[%s449_s0 + $0x68] sm:$0xff]  ;;  %v30_v38 = vld [vmem:[%s449_s0 + $0x78] sm:$0xff]  ;;  %v27_v39 = vld [vmem:[%s449_s0 + $0x60] sm:$0xff] }
   0xe   :  { %108 = vmatprep.subr.mxu0 %v40_v25  ;;  %179 = vmatprep.subr.mxu1 %v42_v26  ;;  %v29_v40 = vld [vmem:[%s449_s0 + $0x70] sm:$0xff]  ;;  %v24_v41 = vld [vmem:[%s449_s0 + $0x48] sm:$0xff]  ;;  %v26_v42 = vld [vmem:[%s449_s0 + $0x58] sm:$0xff] }
   0xf   :  { %109 = vmatpush1.msra.mxu0 %v39_v27  ;;  %180 = vmatpush1.msra.mxu1 %v41_v28  ;;  %v23_v43 = vld [vmem:[%s449_s0 + $0x40] sm:$0xff]  ;;  %v25_v44 = vld [vmem:[%s449_s0 + $0x50] sm:$0xff]  ;;  %v20_v45 = vld [vmem:[%s449_s0 + $0x28] sm:$0xff] }
  0x10   :  { %110 = vmatprep.subr.mxu0 %v36_v29  ;;  %181 = vmatprep.subr.mxu1 %v38_v30  ;;  %v22_v46 = vld [vmem:[%s449_s0 + $0x38] sm:$0xff]  ;;  %v19_v47 = vld [vmem:[%s449_s0 + $0x20] sm:$0xff]  ;;  %v21_v48 = vld [vmem:[%s449_s0 + $0x30] sm:$0xff] }
  0x11   :  { %111 = vmatpush1.msra.mxu0 %v35_v31  ;;  %182 = vmatpush1.msra.mxu1 %v37_v32  ;;  %v16_v49 = vld [vmem:[%s449_s0 + $0x8] sm:$0xff]  ;;  %v18_v50 = vld [vmem:[%s449_s0 + $0x18] sm:$0xff]  ;;  %v15_v51 = vld [vmem:[%s449_s0] sm:$0xff] }
  0x12   :  { %112 = vmatprep.subr.mxu0 %v32_v33  ;;  %183 = vmatprep.subr.mxu1 %v34_v34  ;;  %v17_v52 = vld [vmem:[%s449_s0 + $0x10] sm:$0xff]  ;;  %v14_v53 = vld [vmem:[%s450_s1] sm:$0xff] }
  0x13   :  { %113 = vmatpush1.msra.mxu0 %v31_v35  ;;  %184 = vmatpush1.msra.mxu1 %v33_v36  ;;  %v67_v54 = vld [vmem:[%s451_s2] sm:$0xff] }
  0x14   :  { %114 = vmatprep.subr.mxu0 %v28_v37  ;;  %185 = vmatprep.subr.mxu1 %v30_v38 }
  0x15   :  { %115 = vmatpush1.msra.mxu0 %v27_v39  ;;  %186 = vmatpush1.msra.mxu1 %v29_v40 }
  0x16   :  { %116 = vmatprep.subr.mxu0 %v24_v41  ;;  %187 = vmatprep.subr.mxu1 %v26_v42 }
  0x17   :  { %117 = vmatpush1.msra.mxu0 %v23_v43  ;;  %188 = vmatpush1.msra.mxu1 %v25_v44 }
  0x18   :  { %118 = vmatprep.subr.mxu0 %v20_v45  ;;  %189 = vmatprep.subr.mxu1 %v22_v46 }
  0x19   :  { %119 = vmatpush1.msra.mxu0 %v19_v47  ;;  %190 = vmatpush1.msra.mxu1 %v21_v48 }
  0x1a   :  { %120 = vmatprep.subr.mxu0 %v16_v49  ;;  %191 = vmatprep.subr.mxu1 %v18_v50 }
  0x1b   :  { %121 = vmatpush1.msra.mxu0 %v15_v51  ;;  %192 = vmatpush1.msra.mxu1 %v17_v52 }
  0x1c   :  { %246 = vmatmul.mubr.msk.f32.vlgmr.msra.gmra.mxu0 %vm73_vm1, %v14_v53  ;;  %249 = vmatmul.mubr.msk.f32.vlgmr.msra.gmra.mxu1 %vm73_vm1, %v14_v53 }
  0x1d   :  { %252 = vset.pattern.permute.xlu0 %v254_v55 }
  0x1e   :  { %70 = vperm.xlu0 %252, %v67_v54  }
  0x99   :  { %v71_v56 = vpop.permute.xlu0 %70 }
  0xdc   :  { %v156_v57 = vpop.f32.mrf.mxu0  ;;  %v227_v58 = vpop.f32.mrf.mxu1 }
  0xdd   :  { %v157_v59 = vadd.f32 %v156_v57, %v71_v56  ;;  %v228_v60 = vadd.f32 %v227_v58, %v71_v56 }
  0xde   :  { %v158_v61 = vpop.f32.mrf.mxu0  ;;  %v229_v62 = vpop.f32.mrf.mxu1 }
  0xdf   :  { %v232_v63 = vmax.f32 %v157_v59, 0.0  ;;  %v234_v0 = vmax.f32 %v228_v60, 0.0  ;;  %v159_v1 = vadd.f32 %v158_v61, %v71_v56  ;;  %v230_v2 = vadd.f32 %v229_v62, %v71_v56 }
  0xe1   :  { %236 = vst [vmem:[%s452_s3] sm:$0xff] %v232_v63  ;;  %238 = vst [vmem:[%s452_s3 + $0x10] sm:$0xff] %v234_v0  ;;  %v233_v3 = vmax.f32 %v159_v1, 0.0  ;;  %v235_v4 = vmax.f32 %v230_v2, 0.0 }
  0xe3   :  { %237 = vst [vmem:[%s452_s3 + $0x8] sm:$0xff] %v233_v3  ;;  %239 = vst [vmem:[%s452_s3 + $0x18] sm:$0xff] %v235_v4 }

</bundles_post_ra>
